<compile_context>
chip_gen: v7x
topology: tpu7x:2x2x1
jax: 0.10.0
libtpu: 0.0.40
codegen_flags: <defaults>
</compile_context>

<pallas_src>
import jax
import jax.numpy as jnp
import numpy as np
from jax.experimental import pallas as pl
from jax.experimental.pallas import tpu as pltpu

EPS = 1e-5


def basic_block_kernel(x_ref, t1_ref, g1_ref, b1_ref, t2_ref, g2_ref, b2_ref,
                       r_ref, rt_ref, o_ref, col_ref):
    # Shapes (all static):
    #   x_ref   : [N, H, W*C]        lane-dense input (conv1 src + residual)
    #   t*_ref  : [3*W*C, W*C]       dy-stacked interior block-Toeplitz weights
    #   g*/b*   : [1, C]             BN gamma / beta
    #   r_ref   : [W*C, C]           0/1 lane->channel gather map
    #   rt_ref  : [C, W*C]           0/1 channel->lane broadcast map
    #   o_ref   : [N, H, W*C]
    #   col_ref : [N, H, 3*W*C]      VMEM scratch (im2col-over-dy slab, reused)
    N, H, WC = x_ref.shape
    C = g1_ref.shape[-1]
    W = WC // C
    M = N * H
    K3 = 3 * WC
    cnt = float(N * H * W)

    x_val = x_ref[...]          # single pull; reused for staging + residual

    # Zero only the two h-halo strips, once.  Both conv stagings write the
    # same interior lanes, so these zeros survive for conv2 (no re-zeroing).
    col_ref[:, 0:1, 0:WC] = jnp.zeros((N, 1, WC), jnp.float32)
    col_ref[:, H - 1:H, 2 * WC:3 * WC] = jnp.zeros((N, 1, WC), jnp.float32)

    def stage_im2col(act):
        # Row (n, h) of the slab is [act[h-1] | act[h] | act[h+1]]; the
        # missing h-neighbours are the pre-zeroed strips.  W-padding is folded
        # into the Toeplitz weights, so there is no lane halo.
        col_ref[:, 1:H, 0:WC] = act[:, 0:H - 1, :]
        col_ref[:, :, WC:2 * WC] = act
        col_ref[:, 0:H - 1, 2 * WC:3 * WC] = act[:, 1:H, :]

    def conv3x3(t_ref):
        # One MXU matmul per 3x3 conv: [M, 3*W*C] @ [3*W*C, W*C].
        return jnp.dot(col_ref[...].reshape(M, K3), t_ref[...],
                       preferred_element_type=jnp.float32)

    def batchnorm(acc, g_ref, b_ref):
        # One-pass batch stats (sum & sum-of-squares, var = E[x^2] - mean^2);
        # the per-channel regroup and the back-broadcast are one tiny matmul
        # each (rows stacked), i.e. 2 MXU pushes per BN instead of 4.
        s = jnp.sum(acc, axis=0, keepdims=True)             # [1, W*C]
        q = jnp.sum(acc * acc, axis=0, keepdims=True)       # [1, W*C]
        ch = jnp.dot(jnp.concatenate([s, q], axis=0), r_ref[...],
                     preferred_element_type=jnp.float32)    # [2, C]
        mean = ch[0:1, :] / cnt
        var = ch[1:2, :] / cnt - mean * mean
        scale = g_ref[...] * jax.lax.rsqrt(var + EPS)       # [1, C]
        shift = b_ref[...] - mean * scale                   # [1, C]
        row = jnp.dot(jnp.concatenate([scale, shift], axis=0), rt_ref[...],
                      preferred_element_type=jnp.float32)   # [2, W*C]
        return acc * row[0:1, :] + row[1:2, :]

    # ---- conv1 -> bn1 -> ReLU ----
    stage_im2col(x_val)
    y1 = jnp.maximum(batchnorm(conv3x3(t1_ref), g1_ref, b1_ref), 0.0)

    # ---- conv2 -> bn2 -> +residual -> ReLU  (scratch slab reused) ----
    stage_im2col(y1.reshape(N, H, WC))
    y2 = batchnorm(conv3x3(t2_ref), g2_ref, b2_ref)
    o_ref[...] = jnp.maximum(y2.reshape(N, H, WC) + x_val, 0.0)


def _lower_conv3x3_weights(w_hwio, W):
    """w_hwio: [3, 3, Cin, Cout] -> [3*W*Cin, W*Cout] dy-stacked Toeplitz slab.

    Interior-only rows: pad positions -1 and W are dropped (padding is zero,
    they contribute nothing), so the activation slab needs no lane halo and
    the single conv matmul is lane-aligned at offset 0.
    """
    kh, kw, cin, cout = w_hwio.shape
    slabs = []
    for dy in range(kh):
        t = jnp.zeros((W * cin, W * cout), jnp.float32)
        for dx in range(kw):
            e = np.zeros((W, W), np.float32)
            w_in = np.arange(W) + (dx - 1)           # input column feeding w_out
            ok = (w_in >= 0) & (w_in < W)
            e[w_in[ok], np.arange(W)[ok]] = 1.0
            t = t + jnp.kron(jnp.asarray(e), w_hwio[dy, dx])
        slabs.append(t)
    return jnp.concatenate(slabs, axis=0)            # [3*W*Cin, W*Cout]


@jax.jit
def basic_block_pallas(x_nchw, w1_oihw, g1, b1, w2_oihw, g2, b2):
    """x: [N, C, H, W] (NCHW, as PyTorch); conv weights OIHW [C, C, 3, 3].
    Implements BasicBlock(inplanes=C, planes=C, stride=1, downsample=None,
    dilation=(1, 1), residual=True)."""
    N, Cin, H, W = x_nchw.shape
    Cout, Cin2, kh, kw = w1_oihw.shape
    assert (Cin2, kh, kw) == (Cin, 3, 3) and Cout == Cin, \
        "fused kernel supports stride=1, dilation=1, inplanes == planes"
    assert w2_oihw.shape == (Cout, Cout, 3, 3)

    # NCHW -> lane-dense [N, H, W*C]
    x2d = jnp.transpose(x_nchw, (0, 2, 3, 1)).reshape(N, H, W * Cin)

    # OIHW -> HWIO -> dy-stacked interior block-Toeplitz weight slabs
    t1 = _lower_conv3x3_weights(jnp.transpose(w1_oihw, (2, 3, 1, 0)), W)
    t2 = _lower_conv3x3_weights(jnp.transpose(w2_oihw, (2, 3, 1, 0)), W)

    # 0/1 maps between lanes (w*C + c) and channels c, for BN stats (numpy,
    # constant-folded under jit).
    r = np.zeros((W * Cout, Cout), np.float32)
    r[np.arange(W * Cout), np.arange(W * Cout) % Cout] = 1.0
    rt = np.ascontiguousarray(r.T)

    vmem = pl.BlockSpec(memory_space=pltpu.MemorySpace.VMEM)
    out2d = pl.pallas_call(
        basic_block_kernel,
        out_shape=jax.ShapeDtypeStruct((N, H, W * Cout), jnp.float32),
        in_specs=[vmem] * 9,
        out_specs=vmem,
        scratch_shapes=[pltpu.VMEM((N, H, 3 * W * Cin), jnp.float32)],
        compiler_params=pltpu.CompilerParams(
            vmem_limit_bytes=32 * 1024 * 1024),
    )(x2d, t1, g1.reshape(1, Cout), b1.reshape(1, Cout),
      t2, g2.reshape(1, Cout), b2.reshape(1, Cout),
      jnp.asarray(r), jnp.asarray(rt))

    # lane-dense [N, H, W*C] -> NCHW (free-ish: contiguous reshape + transpose)
    return jnp.transpose(out2d.reshape(N, H, W, Cout), (0, 3, 1, 2))


def basic_block_ref(x, w1, g1, b1, w2, g2, b2):
    """Pure-JAX reference (NCHW / OIHW), training-mode BatchNorm."""
    def conv(x, w):
        return jax.lax.conv_general_dilated(
            x, w, window_strides=(1, 1), padding=((1, 1), (1, 1)),
            dimension_numbers=('NCHW', 'OIHW', 'NCHW'))

    def bn(y, g, b):
        m = jnp.mean(y, axis=(0, 2, 3), keepdims=True)
        v = jnp.mean((y - m) ** 2, axis=(0, 2, 3), keepdims=True)
        return ((y - m) * jax.lax.rsqrt(v + EPS) * g.reshape(1, -1, 1, 1)
                + b.reshape(1, -1, 1, 1))

    out = jax.nn.relu(bn(conv(x, w1), g1, b1))
    out = bn(conv(out, w2), g2, b2)
    return jax.nn.relu(out + x)


if __name__ == "__main__":
    # BasicBlock(inplanes=4, planes=4, stride=1, downsample=None,
    #            dilation=(1, 1), residual=True) on x: [2, 4, 16, 16] (NCHW)
    N, C, H, W = 2, 4, 16, 16

    key = jax.random.PRNGKey(0)
    kx, kw1, kw2, kg1, kb1, kg2, kb2 = jax.random.split(key, 7)

    x = jax.random.normal(kx, (N, C, H, W), jnp.float32)
    w1 = jax.random.normal(kw1, (C, C, 3, 3), jnp.float32) * 0.1   # OIHW
    w2 = jax.random.normal(kw2, (C, C, 3, 3), jnp.float32) * 0.1
    g1 = 1.0 + 0.1 * jax.random.normal(kg1, (C,), jnp.float32)
    b1 = 0.1 * jax.random.normal(kb1, (C,), jnp.float32)
    g2 = 1.0 + 0.1 * jax.random.normal(kg2, (C,), jnp.float32)
    b2 = 0.1 * jax.random.normal(kb2, (C,), jnp.float32)

    out = jax.block_until_ready(basic_block_pallas(x, w1, g1, b1, w2, g2, b2))
    ref = jax.block_until_ready(basic_block_ref(x, w1, g1, b1, w2, g2, b2))
    np.testing.assert_allclose(np.asarray(out), np.asarray(ref),
                               rtol=1e-3, atol=1e-3)
    print("KERNEL_OK")
</pallas_src>

<mosaic_0001>
module attributes {stable_mosaic.version = 11 : i64} {
  func.func @basic_block_kernel(%arg0: memref<2x16x64xf32, #tpu.memory_space<vmem>>, %arg1: memref<192x64xf32, #tpu.memory_space<vmem>>, %arg2: memref<1x4xf32, #tpu.memory_space<vmem>>, %arg3: memref<1x4xf32, #tpu.memory_space<vmem>>, %arg4: memref<192x64xf32, #tpu.memory_space<vmem>>, %arg5: memref<1x4xf32, #tpu.memory_space<vmem>>, %arg6: memref<1x4xf32, #tpu.memory_space<vmem>>, %arg7: memref<64x4xf32, #tpu.memory_space<vmem>>, %arg8: memref<4x64xf32, #tpu.memory_space<vmem>>, %arg9: memref<2x16x64xf32, #tpu.memory_space<vmem>>, %arg10: memref<2x16x192xf32, #tpu.memory_space<vmem>>) attributes {dimension_semantics = [], scalar_prefetch = 0 : i64, scratch_operands = 1 : i64, tpu.core_type = #tpu.core_type<tc>} {
    %c0 = arith.constant 0 : index
    %c0_0 = arith.constant 0 : index
    %c0_1 = arith.constant 0 : index
    %0 = vector.load %arg0[%c0, %c0_0, %c0_1] : memref<2x16x64xf32, #tpu.memory_space<vmem>>, vector<2x16x64xf32>
    %cst = arith.constant 0.000000e+00 : f32
    %1 = vector.broadcast %cst : f32 to vector<2x1x64xf32>
    %c0_2 = arith.constant 0 : index
    %c0_3 = arith.constant 0 : index
    %c0_4 = arith.constant 0 : index
    %2 = vector.load %arg10[%c0_2, %c0_3, %c0_4] : memref<2x16x192xf32, #tpu.memory_space<vmem>>, vector<2x1x64xf32>
    tpu.vector_store %arg10[%c0_2, %c0_3, %c0_4], %1 {strides = array<i32>} : memref<2x16x192xf32, #tpu.memory_space<vmem>>, vector<2x1x64xf32>,
    %cst_5 = arith.constant 0.000000e+00 : f32
    %3 = vector.broadcast %cst_5 : f32 to vector<2x1x64xf32>
    %c0_6 = arith.constant 0 : index
    %c15 = arith.constant 15 : index
    %c128 = arith.constant 128 : index
    %4 = vector.load %arg10[%c0_6, %c15, %c128] : memref<2x16x192xf32, #tpu.memory_space<vmem>>, vector<2x1x64xf32>
    tpu.vector_store %arg10[%c0_6, %c15, %c128], %3 {strides = array<i32>} : memref<2x16x192xf32, #tpu.memory_space<vmem>>, vector<2x1x64xf32>,
    %5 = vector.extract_strided_slice %0 {offsets = [0, 0, 0], sizes = [2, 15, 64], strides = [1, 1, 1]} : vector<2x16x64xf32> to vector<2x15x64xf32>
    %c0_7 = arith.constant 0 : index
    %c1 = arith.constant 1 : index
    %c0_8 = arith.constant 0 : index
    %6 = vector.load %arg10[%c0_7, %c1, %c0_8] : memref<2x16x192xf32, #tpu.memory_space<vmem>>, vector<2x15x64xf32>
    tpu.vector_store %arg10[%c0_7, %c1, %c0_8], %5 {strides = array<i32>} : memref<2x16x192xf32, #tpu.memory_space<vmem>>, vector<2x15x64xf32>,
    %c0_9 = arith.constant 0 : index
    %c0_10 = arith.constant 0 : index
    %c64 = arith.constant 64 : index
    %7 = vector.load %arg10[%c0_9, %c0_10, %c64] : memref<2x16x192xf32, #tpu.memory_space<vmem>>, vector<2x16x64xf32>
    tpu.vector_store %arg10[%c0_9, %c0_10, %c64], %0 {strides = array<i32>} : memref<2x16x192xf32, #tpu.memory_space<vmem>>, vector<2x16x64xf32>,
    %8 = vector.extract_strided_slice %0 {offsets = [0, 1, 0], sizes = [2, 15, 64], strides = [1, 1, 1]} : vector<2x16x64xf32> to vector<2x15x64xf32>
    %c0_11 = arith.constant 0 : index
    %c0_12 = arith.constant 0 : index
    %c128_13 = arith.constant 128 : index
    %9 = vector.load %arg10[%c0_11, %c0_12, %c128_13] : memref<2x16x192xf32, #tpu.memory_space<vmem>>, vector<2x15x64xf32>
    tpu.vector_store %arg10[%c0_11, %c0_12, %c128_13], %8 {strides = array<i32>} : memref<2x16x192xf32, #tpu.memory_space<vmem>>, vector<2x15x64xf32>,
    %c0_14 = arith.constant 0 : index
    %c0_15 = arith.constant 0 : index
    %c0_16 = arith.constant 0 : index
    %10 = vector.load %arg10[%c0_14, %c0_15, %c0_16] : memref<2x16x192xf32, #tpu.memory_space<vmem>>, vector<2x16x192xf32>
    %11 = vector.shape_cast %10 : vector<2x16x192xf32> to vector<32x192xf32>
    %c0_17 = arith.constant 0 : index
    %c0_18 = arith.constant 0 : index
    %12 = vector.load %arg1[%c0_17, %c0_18] : memref<192x64xf32, #tpu.memory_space<vmem>>, vector<192x64xf32>
    %cst_19 = arith.constant dense<0.000000e+00> : vector<32x64xf32>
    %13 = tpu.matmul %11, %12, %cst_19 {dimension_numbers = #tpu.dot_dimension_numbers<[1], [0], [0], [1], [0, 0, 1, 1], [], []>} : vector<32x192xf32>, vector<192x64xf32>, vector<32x64xf32> -> vector<32x64xf32>
    %cst_20 = arith.constant dense<0.000000e+00> : vector<64xf32>
    %14 = vector.multi_reduction <add>, %13, %cst_20 [0] : vector<32x64xf32> to vector<64xf32>
    %15 = vector.shape_cast %14 : vector<64xf32> to vector<1x64xf32>
    %16 = arith.mulf %13, %13 : vector<32x64xf32>
    %cst_21 = arith.constant dense<0.000000e+00> : vector<64xf32>
    %17 = vector.multi_reduction <add>, %16, %cst_21 [0] : vector<32x64xf32> to vector<64xf32>
    %18 = vector.shape_cast %17 : vector<64xf32> to vector<1x64xf32>
    %19 = tpu.concatenate %15, %18 in 0 : vector<1x64xf32>, vector<1x64xf32> -> vector<2x64xf32>
    %c0_22 = arith.constant 0 : index
    %c0_23 = arith.constant 0 : index
    %20 = vector.load %arg7[%c0_22, %c0_23] : memref<64x4xf32, #tpu.memory_space<vmem>>, vector<64x4xf32>
    %cst_24 = arith.constant dense<0.000000e+00> : vector<2x4xf32>
    %21 = tpu.matmul %19, %20, %cst_24 {dimension_numbers = #tpu.dot_dimension_numbers<[1], [0], [0], [1], [0, 0, 1, 1], [], []>} : vector<2x64xf32>, vector<64x4xf32>, vector<2x4xf32> -> vector<2x4xf32>
    %22 = vector.extract_strided_slice %21 {offsets = [0, 0], sizes = [1, 4], strides = [1, 1]} : vector<2x4xf32> to vector<1x4xf32>
    %cst_25 = arith.constant 5.120000e+02 : f32
    %23 = vector.broadcast %cst_25 : f32 to vector<1x4xf32>
    %24 = arith.divf %22, %23 : vector<1x4xf32>
    %25 = vector.extract_strided_slice %21 {offsets = [1, 0], sizes = [1, 4], strides = [1, 1]} : vector<2x4xf32> to vector<1x4xf32>
    %cst_26 = arith.constant 5.120000e+02 : f32
    %26 = vector.broadcast %cst_26 : f32 to vector<1x4xf32>
    %27 = arith.divf %25, %26 : vector<1x4xf32>
    %28 = arith.mulf %24, %24 : vector<1x4xf32>
    %29 = arith.subf %27, %28 : vector<1x4xf32>
    %c0_27 = arith.constant 0 : index
    %c0_28 = arith.constant 0 : index
    %30 = vector.load %arg2[%c0_27, %c0_28] : memref<1x4xf32, #tpu.memory_space<vmem>>, vector<1x4xf32>
    %cst_29 = arith.constant 9.99999974E-6 : f32
    %31 = vector.broadcast %cst_29 : f32 to vector<1x4xf32>
    %32 = arith.addf %29, %31 : vector<1x4xf32>
    %33 = math.rsqrt %32 : vector<1x4xf32>
    %34 = arith.mulf %30, %33 : vector<1x4xf32>
    %c0_30 = arith.constant 0 : index
    %c0_31 = arith.constant 0 : index
    %35 = vector.load %arg3[%c0_30, %c0_31] : memref<1x4xf32, #tpu.memory_space<vmem>>, vector<1x4xf32>
    %36 = arith.mulf %24, %34 : vector<1x4xf32>
    %37 = arith.subf %35, %36 : vector<1x4xf32>
    %38 = tpu.concatenate %34, %37 in 0 : vector<1x4xf32>, vector<1x4xf32> -> vector<2x4xf32>
    %c0_32 = arith.constant 0 : index
    %c0_33 = arith.constant 0 : index
    %39 = vector.load %arg8[%c0_32, %c0_33] : memref<4x64xf32, #tpu.memory_space<vmem>>, vector<4x64xf32>
    %cst_34 = arith.constant dense<0.000000e+00> : vector<2x64xf32>
    %40 = tpu.matmul %38, %39, %cst_34 {dimension_numbers = #tpu.dot_dimension_numbers<[1], [0], [0], [1], [0, 0, 1, 1], [], []>} : vector<2x4xf32>, vector<4x64xf32>, vector<2x64xf32> -> vector<2x64xf32>
    %41 = vector.extract_strided_slice %40 {offsets = [0, 0], sizes = [1, 64], strides = [1, 1]} : vector<2x64xf32> to vector<1x64xf32>
    %42 = vector.broadcast %41 : vector<1x64xf32> to vector<32x64xf32>
    %43 = arith.mulf %13, %42 : vector<32x64xf32>
    %44 = vector.extract_strided_slice %40 {offsets = [1, 0], sizes = [1, 64], strides = [1, 1]} : vector<2x64xf32> to vector<1x64xf32>
    %45 = vector.broadcast %44 : vector<1x64xf32> to vector<32x64xf32>
    %46 = arith.addf %43, %45 : vector<32x64xf32>
    %cst_35 = arith.constant 0.000000e+00 : f32
    %47 = vector.broadcast %cst_35 : f32 to vector<32x64xf32>
    %48 = arith.maximumf %46, %47 : vector<32x64xf32>
    %49 = vector.shape_cast %48 : vector<32x64xf32> to vector<2x16x64xf32>
    %50 = vector.extract_strided_slice %49 {offsets = [0, 0, 0], sizes = [2, 15, 64], strides = [1, 1, 1]} : vector<2x16x64xf32> to vector<2x15x64xf32>
    %c0_36 = arith.constant 0 : index
    %c1_37 = arith.constant 1 : index
    %c0_38 = arith.constant 0 : index
    %51 = vector.load %arg10[%c0_36, %c1_37, %c0_38] : memref<2x16x192xf32, #tpu.memory_space<vmem>>, vector<2x15x64xf32>
    tpu.vector_store %arg10[%c0_36, %c1_37, %c0_38], %50 {strides = array<i32>} : memref<2x16x192xf32, #tpu.memory_space<vmem>>, vector<2x15x64xf32>,
    %c0_39 = arith.constant 0 : index
    %c0_40 = arith.constant 0 : index
    %c64_41 = arith.constant 64 : index
    %52 = vector.load %arg10[%c0_39, %c0_40, %c64_41] : memref<2x16x192xf32, #tpu.memory_space<vmem>>, vector<2x16x64xf32>
    tpu.vector_store %arg10[%c0_39, %c0_40, %c64_41], %49 {strides = array<i32>} : memref<2x16x192xf32, #tpu.memory_space<vmem>>, vector<2x16x64xf32>,
    %53 = vector.extract_strided_slice %49 {offsets = [0, 1, 0], sizes = [2, 15, 64], strides = [1, 1, 1]} : vector<2x16x64xf32> to vector<2x15x64xf32>
    %c0_42 = arith.constant 0 : index
    %c0_43 = arith.constant 0 : index
    %c128_44 = arith.constant 128 : index
    %54 = vector.load %arg10[%c0_42, %c0_43, %c128_44] : memref<2x16x192xf32, #tpu.memory_space<vmem>>, vector<2x15x64xf32>
    tpu.vector_store %arg10[%c0_42, %c0_43, %c128_44], %53 {strides = array<i32>} : memref<2x16x192xf32, #tpu.memory_space<vmem>>, vector<2x15x64xf32>,
    %c0_45 = arith.constant 0 : index
    %c0_46 = arith.constant 0 : index
    %c0_47 = arith.constant 0 : index
    %55 = vector.load %arg10[%c0_45, %c0_46, %c0_47] : memref<2x16x192xf32, #tpu.memory_space<vmem>>, vector<2x16x192xf32>
    %56 = vector.shape_cast %55 : vector<2x16x192xf32> to vector<32x192xf32>
    %c0_48 = arith.constant 0 : index
    %c0_49 = arith.constant 0 : index
    %57 = vector.load %arg4[%c0_48, %c0_49] : memref<192x64xf32, #tpu.memory_space<vmem>>, vector<192x64xf32>
    %cst_50 = arith.constant dense<0.000000e+00> : vector<32x64xf32>
    %58 = tpu.matmul %56, %57, %cst_50 {dimension_numbers = #tpu.dot_dimension_numbers<[1], [0], [0], [1], [0, 0, 1, 1], [], []>} : vector<32x192xf32>, vector<192x64xf32>, vector<32x64xf32> -> vector<32x64xf32>
    %cst_51 = arith.constant dense<0.000000e+00> : vector<64xf32>
    %59 = vector.multi_reduction <add>, %58, %cst_51 [0] : vector<32x64xf32> to vector<64xf32>
    %60 = vector.shape_cast %59 : vector<64xf32> to vector<1x64xf32>
    %61 = arith.mulf %58, %58 : vector<32x64xf32>
    %cst_52 = arith.constant dense<0.000000e+00> : vector<64xf32>
    %62 = vector.multi_reduction <add>, %61, %cst_52 [0] : vector<32x64xf32> to vector<64xf32>
    %63 = vector.shape_cast %62 : vector<64xf32> to vector<1x64xf32>
    %64 = tpu.concatenate %60, %63 in 0 : vector<1x64xf32>, vector<1x64xf32> -> vector<2x64xf32>
    %c0_53 = arith.constant 0 : index
    %c0_54 = arith.constant 0 : index
    %65 = vector.load %arg7[%c0_53, %c0_54] : memref<64x4xf32, #tpu.memory_space<vmem>>, vector<64x4xf32>
    %cst_55 = arith.constant dense<0.000000e+00> : vector<2x4xf32>
    %66 = tpu.matmul %64, %65, %cst_55 {dimension_numbers = #tpu.dot_dimension_numbers<[1], [0], [0], [1], [0, 0, 1, 1], [], []>} : vector<2x64xf32>, vector<64x4xf32>, vector<2x4xf32> -> vector<2x4xf32>
    %67 = vector.extract_strided_slice %66 {offsets = [0, 0], sizes = [1, 4], strides = [1, 1]} : vector<2x4xf32> to vector<1x4xf32>
    %cst_56 = arith.constant 5.120000e+02 : f32
    %68 = vector.broadcast %cst_56 : f32 to vector<1x4xf32>
    %69 = arith.divf %67, %68 : vector<1x4xf32>
    %70 = vector.extract_strided_slice %66 {offsets = [1, 0], sizes = [1, 4], strides = [1, 1]} : vector<2x4xf32> to vector<1x4xf32>
    %cst_57 = arith.constant 5.120000e+02 : f32
    %71 = vector.broadcast %cst_57 : f32 to vector<1x4xf32>
    %72 = arith.divf %70, %71 : vector<1x4xf32>
    %73 = arith.mulf %69, %69 : vector<1x4xf32>
    %74 = arith.subf %72, %73 : vector<1x4xf32>
    %c0_58 = arith.constant 0 : index
    %c0_59 = arith.constant 0 : index
    %75 = vector.load %arg5[%c0_58, %c0_59] : memref<1x4xf32, #tpu.memory_space<vmem>>, vector<1x4xf32>
    %cst_60 = arith.constant 9.99999974E-6 : f32
    %76 = vector.broadcast %cst_60 : f32 to vector<1x4xf32>
    %77 = arith.addf %74, %76 : vector<1x4xf32>
    %78 = math.rsqrt %77 : vector<1x4xf32>
    %79 = arith.mulf %75, %78 : vector<1x4xf32>
    %c0_61 = arith.constant 0 : index
    %c0_62 = arith.constant 0 : index
    %80 = vector.load %arg6[%c0_61, %c0_62] : memref<1x4xf32, #tpu.memory_space<vmem>>, vector<1x4xf32>
    %81 = arith.mulf %69, %79 : vector<1x4xf32>
    %82 = arith.subf %80, %81 : vector<1x4xf32>
    %83 = tpu.concatenate %79, %82 in 0 : vector<1x4xf32>, vector<1x4xf32> -> vector<2x4xf32>
    %c0_63 = arith.constant 0 : index
    %c0_64 = arith.constant 0 : index
    %84 = vector.load %arg8[%c0_63, %c0_64] : memref<4x64xf32, #tpu.memory_space<vmem>>, vector<4x64xf32>
    %cst_65 = arith.constant dense<0.000000e+00> : vector<2x64xf32>
    %85 = tpu.matmul %83, %84, %cst_65 {dimension_numbers = #tpu.dot_dimension_numbers<[1], [0], [0], [1], [0, 0, 1, 1], [], []>} : vector<2x4xf32>, vector<4x64xf32>, vector<2x64xf32> -> vector<2x64xf32>
    %86 = vector.extract_strided_slice %85 {offsets = [0, 0], sizes = [1, 64], strides = [1, 1]} : vector<2x64xf32> to vector<1x64xf32>
    %87 = vector.broadcast %86 : vector<1x64xf32> to vector<32x64xf32>
    %88 = arith.mulf %58, %87 : vector<32x64xf32>
    %89 = vector.extract_strided_slice %85 {offsets = [1, 0], sizes = [1, 64], strides = [1, 1]} : vector<2x64xf32> to vector<1x64xf32>
    %90 = vector.broadcast %89 : vector<1x64xf32> to vector<32x64xf32>
    %91 = arith.addf %88, %90 : vector<32x64xf32>
    %92 = vector.shape_cast %91 : vector<32x64xf32> to vector<2x16x64xf32>
    %93 = arith.addf %92, %0 : vector<2x16x64xf32>
    %cst_66 = arith.constant 0.000000e+00 : f32
    %94 = vector.broadcast %cst_66 : f32 to vector<2x16x64xf32>
    %95 = arith.maximumf %93, %94 : vector<2x16x64xf32>
    %c0_67 = arith.constant 0 : index
    %c0_68 = arith.constant 0 : index
    %c0_69 = arith.constant 0 : index
    %96 = vector.load %arg9[%c0_67, %c0_68, %c0_69] : memref<2x16x64xf32, #tpu.memory_space<vmem>>, vector<2x16x64xf32>
    tpu.vector_store %arg9[%c0_67, %c0_68, %c0_69], %95 {strides = array<i32>} : memref<2x16x64xf32, #tpu.memory_space<vmem>>, vector<2x16x64xf32>,
    return
  }
}

</mosaic_0001>

<bundles_post_ra>
// kernel: basic_block_pallas.1
= control target key start
LH: loop header
LB: loop body
LE: loop exit
PB: predicated region body
PF: predicated region fallthrough
CT: control target
= control target key end

     0   :  { %vm58_vm0 = vcmask 523264   ;;  %vm79_vm1 = vcmask 1046528   ;;  %vm91_vm2 = vcmask 522240   ;;  %v1097_v3 = vmov 0.0|0.0   ;;  %s1098_s15 = smov 64   ;;  %s1571_s0 = inlined_call_operand.vmem [shape: f32[2,16,64], index: 0, kind: input, shape index: {}]   ;;  %s1572_s1 = inlined_call_operand.vmem [shape: f32[192,64], index: 1, kind: input, shape index: {}]   ;;  %s1573_s7 = inlined_call_operand.vmem [shape: f32[64,4], index: 7, kind: input, shape index: {}]   ;;  %s1574_s8 = inlined_call_operand.vmem [shape: f32[4,64], index: 8, kind: input, shape index: {}]   ;;  %s1575_s2 = inlined_call_operand.vmem [shape: f32[1,4], index: 2, kind: input, shape index: {}]   ;;  %s1576_s3 = inlined_call_operand.vmem [shape: f32[1,4], index: 3, kind: input, shape index: {}]   ;;  %s1577_s4 = inlined_call_operand.vmem [shape: f32[192,64], index: 4, kind: input, shape index: {}]   ;;  %s1578_s5 = inlined_call_operand.vmem [shape: f32[1,4], index: 5, kind: input, shape index: {}]   ;;  %s1579_s6 = inlined_call_operand.vmem [shape: f32[1,4], index: 6, kind: input, shape index: {}]   ;;  %s1580_s9 = inlined_call_operand.vmem [shape: f32[2,16,64], index: 9, kind: output, shape index: {}]  }
   0x1   :  { %v1155_v0 = vld [vmem:[%s1571_s0] sm:$0xff]  ;;  %v1160_v1 = vld [vmem:[%s1571_s0 + $0x8] sm:$0xff]  ;;  %v1165_v2 = vld [vmem:[%s1571_s0 + $0x10] sm:$0xff]  ;;  %992 = vmatprep.subr.bf16.mxu0 %v1097_v3  ;;  %vm36_vm3 = vcmask 516096   ;;  %vm56_vm4 = vcmask 523265   ;;  %1028 = vmatprep.subr.bf16.mxu1 %v1097_v3  ;;  %v1099_v10 = vmov 0.0  }
   0x2   :  { %62 = vrot.lane.b32.xlu0 %v1155_v0, %s1098_s15  ;;  %v46_v4 = vrot.slane %v1155_v0, 7  ;;  %v80_v5 = vrot.slane %v1155_v0, 1  ;;  %v47_v6 = vrot.slane %v1160_v1, 7  ;;  %v81_v7 = vrot.slane %v1160_v1, 1  ;;  %66 = vrot.lane.b32.xlu1 %v1165_v2, %s1098_s15  ;;  %v1180_v8 = vld [vmem:[%s1571_s0 + $0x18] sm:$0xff]  ;;  %v103_v9 = vld [vmem:[%s1572_s1] sm:$0xff] }
   0x3   :  { %37 = vst.msk [vmem:[#allocation2] sm:$0x1] %vm36_vm3, %v1099_v10  ;;  %39 = vst.msk [vmem:[#allocation2 + $0x1f] sm:$0x1] %vm36_vm3, %v1099_v10  ;;  %v49_v11 = vrot.slane %v1165_v2, 7  ;;  %v83_v12 = vrot.slane %v1165_v2, 1 }
   0x4   :  { %40 = vst.msk [vmem:[#allocation2 + $0x3f] sm:$0x1] %vm36_vm3, %v1099_v10  ;;  %38 = vst.msk [vmem:[#allocation2 + $0x20] sm:$0x1] %vm36_vm3, %v1099_v10  ;;  %v50_v13 = vrot.slane %v1180_v8, 7  ;;  %v84_v14 = vrot.slane %v1180_v8, 1  ;;  %v82_v16 = vsel %vm79_vm1, %v80_v5, %v81_v7 }
   0x5   :  { %v104_v15 = vld [vmem:[%s1572_s1 + $0x8] sm:$0xff]  ;;  %92 = vst.msk [vmem:[#allocation2 + $0x18] sm:$0x7f] %vm91_vm2, %v81_v7  ;;  %v105_v18 = vld [vmem:[%s1572_s1 + $0x10] sm:$0xff]  ;;  %v106_v19 = vld [vmem:[%s1572_s1 + $0x18] sm:$0xff]  ;;  %vm45_vm5 = vcmask 1040384  }
   0x6   :  { %v993_v17 = vpack.c.bf16 %v104_v15, %v103_v9  ;;  %57 = vst.msk [vmem:[#allocation2] sm:$0xfe] %vm56_vm4, %v46_v4  ;;  %v85_v20 = vsel %vm79_vm1, %v83_v12, %v84_v14  ;;  %60 = vst.msk [vmem:[#allocation2 + $0x20] sm:$0xfe] %vm56_vm4, %v49_v11  ;;  %v48_v21 = vsel %vm45_vm5, %v46_v4, %v47_v6  ;;  %64 = vrot.lane.b32.xlu0 %v1160_v1, %s1098_s15  ;;  %v107_v24 = vld [vmem:[%s1572_s1 + $0x20] sm:$0xff]  ;;  %v108_v25 = vld [vmem:[%s1572_s1 + $0x28] sm:$0xff] }
   0x7   :  { %90 = vst.msk [vmem:[#allocation2 + $0x8] sm:$0xff] %vm58_vm0, %v82_v16  ;;  %68 = vrot.lane.b32.xlu1 %v1180_v8, %s1098_s15  ;;  %93 = vst.msk [vmem:[#allocation2 + $0x28] sm:$0xff] %vm58_vm0, %v85_v20  ;;  %v51_v22 = vsel %vm45_vm5, %v49_v11, %v50_v13  ;;  %v996_v23 = vpack.c.bf16 %v106_v19, %v105_v18  ;;  %v999_v26 = vpack.c.bf16 %v108_v25, %v107_v24  ;;  %v109_v27 = vld [vmem:[%s1572_s1 + $0x30] sm:$0xff]  ;;  %v110_v28 = vld [vmem:[%s1572_s1 + $0x38] sm:$0xff]  ;;  %vm74_vm6 = vcmask 1048064  }
   0x8   :  { %94 = vst.msk [vmem:[#allocation2 + $0x38] sm:$0x7f] %vm91_vm2, %v84_v14  ;;  %994 = vmatpush1.bf16.msra.mxu0 %v993_v17  ;;  %v1002_v30 = vpack.c.bf16 %v110_v28, %v109_v27  ;;  %v111_v31 = vld [vmem:[%s1572_s1 + $0x40] sm:$0xff]  ;;  %v112_v32 = vld [vmem:[%s1572_s1 + $0x48] sm:$0xff]  ;;  %v113_v34 = vld [vmem:[%s1572_s1 + $0x50] sm:$0xff]  ;;  %vm1100_vm7 = vmmov 0  }
   0x9   :  { %59 = vst.msk [vmem:[#allocation2 + $0x10] sm:$0xff] %vm58_vm0, %v48_v21  ;;  %61 = vst.msk [vmem:[#allocation2 + $0x30] sm:$0xff] %vm58_vm0, %v51_v22  ;;  %995 = vmatprep.subr.bf16.mxu0 %v1097_v3  ;;  %v1005_v33 = vpack.c.bf16 %v112_v32, %v111_v31  ;;  %v114_v35 = vld [vmem:[%s1572_s1 + $0x58] sm:$0xff]  ;;  %v115_v37 = vld [vmem:[%s1572_s1 + $0x60] sm:$0xff]  ;;  %960 = vmatprep.mubr.msk.f32.mxu1 %vm1100_vm7, %v1099_v10  ;;  %vm379_vm8 = vcmask 1043456   ;;  %vm375_vm9 = vcmask 31744  }
   0xa   :  { %v1008_v36 = vpack.c.bf16 %v114_v35, %v113_v34  ;;  %v116_v38 = vld [vmem:[%s1572_s1 + $0x68] sm:$0xff]  ;;  %v117_v40 = vld [vmem:[%s1572_s1 + $0x70] sm:$0xff]  ;;  %v118_v41 = vld [vmem:[%s1572_s1 + $0x78] sm:$0xff] }
   0xb   :  { %v1011_v39 = vpack.c.bf16 %v116_v38, %v115_v37  ;;  %v1014_v42 = vpack.c.bf16 %v118_v41, %v117_v40  ;;  %v119_v43 = vld [vmem:[%s1572_s1 + $0x80] sm:$0xff]  ;;  %v120_v44 = vld [vmem:[%s1572_s1 + $0x88] sm:$0xff]  ;;  %v121_v46 = vld [vmem:[%s1572_s1 + $0x90] sm:$0xff] }
   0xc   :  { %997 = vmatpush1.bf16.msra.mxu0 %v996_v23  ;;  %v1017_v45 = vpack.c.bf16 %v120_v44, %v119_v43  ;;  %v122_v47 = vld [vmem:[%s1572_s1 + $0x98] sm:$0xff]  ;;  %v123_v49 = vld [vmem:[%s1572_s1 + $0xa0] sm:$0xff]  ;;  %v124_v50 = vld [vmem:[%s1572_s1 + $0xa8] sm:$0xff] }
   0xd   :  { %998 = vmatprep.subr.bf16.mxu0 %v1097_v3  ;;  %v1020_v48 = vpack.c.bf16 %v122_v47, %v121_v46  ;;  %v1023_v51 = vpack.c.bf16 %v124_v50, %v123_v49  ;;  %v125_v52 = vld [vmem:[%s1572_s1 + $0xb0] sm:$0xff]  ;;  %v126_v53 = vld [vmem:[%s1572_s1 + $0xb8] sm:$0xff]  ;;  %v255_v6 = vld [vmem:[%s1573_s7] sm:$0xff] }
   0xe   :  { %v96_v29 = vld [vmem:[#allocation2 + $0x8] sm:$0xff]  ;;  %v1026_v54 = vpack.c.bf16 %v126_v53, %v125_v52  ;;  %v98_v59 = vld [vmem:[#allocation2 + $0x18] sm:$0xff]  ;;  %v257_v11 = vld [vmem:[%s1573_s7 + $0x10] sm:$0xff] }
   0xf   :  { %908 = vmatprep.mubr.msk.f32.mxu0 %vm58_vm0, %v96_v29  ;;  %v100_v61 = vld [vmem:[#allocation2 + $0x28] sm:$0xff]  ;;  %v102_v4 = vld [vmem:[#allocation2 + $0x38] sm:$0xff]  ;;  %v259_v14 = vld [vmem:[%s1573_s7 + $0x20] sm:$0xff] }
  0x10   :  { %1000 = vmatpush1.bf16.msra.mxu0 %v999_v26  ;;  %v256_v7 = vld [vmem:[%s1573_s7 + $0x8] sm:$0xff]  ;;  %v258_v12 = vld [vmem:[%s1573_s7 + $0x18] sm:$0xff]  ;;  %v261_v17 = vld [vmem:[%s1573_s7 + $0x30] sm:$0xff] }
  0x11   :  { %1001 = vmatprep.subr.bf16.mxu0 %v1097_v3  ;;  %v1029_v9 = vpack.c.bf16 %v256_v7, %v255_v6  ;;  %v1032_v13 = vpack.c.bf16 %v258_v12, %v257_v11  ;;  %v260_v15 = vld [vmem:[%s1573_s7 + $0x28] sm:$0xff]  ;;  %v262_v18 = vld [vmem:[%s1573_s7 + $0x38] sm:$0xff]  ;;  %v1101_v7 = vmov 1966171168   ;;  %v350_v11 = vlaneseq }
  0x12   :  { %v1035_v16 = vpack.c.bf16 %v260_v15, %v259_v14  ;;  %v1038_v19 = vpack.c.bf16 %v262_v18, %v261_v17  ;;  %v343_v18 = vld [vmem:[%s1575_s2] sm:$0x1] }
  0x13   :  { %1030 = vmatpush3.bf16.msra.mxu1 %v1029_v9 }
  0x14   :  { %1003 = vmatpush1.bf16.msra.mxu0 %v1002_v30  ;;  %1031 = vmatprep.subr.bf16.mxu1 %v1097_v3 }
  0x15   :  { %1004 = vmatprep.subr.bf16.mxu0 %v1097_v3 }
  0x17   :  { %1033 = vmatpush3.bf16.msra.mxu1 %v1032_v13 }
  0x18   :  { %1006 = vmatpush1.bf16.msra.mxu0 %v1005_v33  ;;  %1034 = vmatprep.subr.bf16.mxu1 %v1097_v3 }
  0x19   :  { %1007 = vmatprep.subr.bf16.mxu0 %v1097_v3 }
  0x1b   :  { %1036 = vmatpush3.bf16.msra.mxu1 %v1035_v16 }
  0x1c   :  { %1009 = vmatpush1.bf16.msra.mxu0 %v1008_v36  ;;  %1037 = vmatprep.subr.bf16.mxu1 %v1097_v3 }
  0x1d   :  { %1010 = vmatprep.subr.bf16.mxu0 %v1097_v3 }
  0x1f   :  { %1039 = vmatpush3.bf16.msra.mxu1 %v1038_v19 }
  0x20   :  { %1012 = vmatpush1.bf16.msra.mxu0 %v1011_v39  ;;  %963 = vmatprep.subr.mxu1 %v1099_v10 }
  0x21   :  { %1013 = vmatprep.subr.bf16.mxu0 %v1097_v3 }
  0x24   :  { %1015 = vmatpush1.bf16.msra.mxu0 %v1014_v42 }
  0x25   :  { %1016 = vmatprep.subr.bf16.mxu0 %v1097_v3 }
  0x28   :  { %1018 = vmatpush1.bf16.msra.mxu0 %v1017_v45 }
  0x29   :  { %1019 = vmatprep.subr.bf16.mxu0 %v1097_v3 }
  0x2c   :  { %1021 = vmatpush1.bf16.msra.mxu0 %v1020_v48 }
  0x2d   :  { %1022 = vmatprep.subr.bf16.mxu0 %v1097_v3 }
  0x30   :  { %1024 = vmatpush1.bf16.msra.mxu0 %v1023_v51 }
  0x31   :  { %1025 = vmatprep.subr.bf16.mxu0 %v1097_v3 }
  0x34   :  { %1027 = vmatpush1.bf16.msra.mxu0 %v1026_v54 }
  0x35   :  { %1076 = vmatprep.subr.bf16.mxu0 %v1097_v3 }
  0x74   :  { %v63_v55 = vpop.permute.xlu0 %62  ;;  %v67_v56 = vpop.permute.xlu1 %66 }
  0x75   :  { %75 = vst.msk [vmem:[#allocation2] sm:$0xff] %vm74_vm6, %v63_v55  ;;  %77 = vst.msk [vmem:[#allocation2 + $0x20] sm:$0xff] %vm74_vm6, %v67_v56 }
  0x78   :  { %v65_v57 = vpop.permute.xlu0 %64 }
  0x79   :  { %v69_v58 = vpop.permute.xlu1 %68  ;;  %76 = vst.msk [vmem:[#allocation2 + $0x10] sm:$0xff] %vm74_vm6, %v65_v57 }
  0x7a   :  { %78 = vst.msk [vmem:[#allocation2 + $0x30] sm:$0xff] %vm74_vm6, %v69_v58 }
  0x7c   :  { %v95_v60 = vld [vmem:[#allocation2] sm:$0xff] }
  0x7d   :  { %204 = vmatmul.mubr.f32.vlgmr.msra.gmra.mrb[0].mxu0 %v95_v60  ;;  %v99_v63 = vld [vmem:[#allocation2 + $0x20] sm:$0xff] }
  0x7e   :  { %909 = vmatprep.mubr.msk.f32.mxu0 %vm58_vm0, %v98_v59  ;;  %1078 = vmatpush3.bf16.msra.mxu0 %v1029_v9  ;;  %v374_v59 = vld [vmem:[%s1574_s8] sm:$0xf]  ;;  %v348_v9 = vunpack.c.l.s4 %v1101_v7 }
  0x7f   :  { %1079 = vmatprep.subr.bf16.mxu0 %v1097_v3 }
  0x80   :  { %v97_v62 = vld [vmem:[#allocation2 + $0x10] sm:$0xff]  ;;  %v349_v12 = vunpack.c.0.s8 %v348_v9 }
  0x81   :  { %209 = vmatmul.mubr.f32.gmra.mrb[2].mxu0 %v97_v62  ;;  %v101_v5 = vld [vmem:[#allocation2 + $0x30] sm:$0xff] }
  0x82   :  { %910 = vmatprep.mubr.msk.f32.mxu0 %vm58_vm0, %v100_v61  ;;  %1081 = vmatpush3.bf16.msra.mxu0 %v1032_v13  ;;  %v1375_v13 = vshrl.u32 %v350_v11, 7 }
  0x83   :  { %1082 = vmatprep.subr.bf16.mxu0 %v1097_v3 }
  0x84   :  { %v1378_v14 = vsub.s32 %v349_v12, %v1375_v13 }
  0x85   :  { %214 = vmatmul.mubr.f32.gmra.mrb[4].mxu0 %v99_v63 }
  0x86   :  { %911 = vmatprep.mubr.msk.f32.mxu0 %vm58_vm0, %v102_v4  ;;  %1084 = vmatpush3.bf16.msra.mxu0 %v1035_v16 }
  0x87   :  { %1085 = vmatprep.subr.bf16.mxu0 %v1097_v3 }
  0x89   :  { %219 = vmatmul.mubr.f32.gmra.mrb[6].mxu0 %v101_v5 }
  0x8a   :  { %984 = vmatprep.mubr.msk.f32.mxu0 %vm1100_vm7, %v1099_v10  ;;  %1087 = vmatpush3.bf16.msra.mxu0 %v1038_v19 }
  0x8b   :  { %987 = vmatprep.subr.mxu0 %v1099_v10 }
 0x150   :  { %v1338_v20 = vpop.f32.mrb[0].mxu0 }
 0x151   :  { %v207_v21 = vpop.f32.mrb[1].mxu0  ;;  %v237_v22 = vmul.f32 %v1338_v20, %v1338_v20  ;;  %v224_v24 = vsel %vm58_vm0, %v1338_v20, 0.0 }
 0x153   :  { %v241_v29 = vsel %vm58_vm0, %v237_v22, 0.0  ;;  %v364_v22 = vld [vmem:[%s1576_s3] sm:$0x1] }
 0x154   :  { %v1342_v23 = vpop.f32.mrb[2].mxu0 }
 0x155   :  { %v225_v25 = vsel %vm58_vm0, %v1342_v23, 0.0  ;;  %v238_v26 = vmul.f32 %v1342_v23, %v1342_v23  ;;  %v212_v27 = vpop.f32.mrb[3].mxu0 }
 0x156   :  { %v226_v28 = vadd.f32 %v225_v25, %v224_v24  ;;  %v1389_v25 = vsub.s32 0, %v1375_v13 }
 0x157   :  { %v242_v30 = vsel %vm58_vm0, %v238_v26, 0.0 }
 0x158   :  { %v243_v31 = vadd.f32 %v242_v30, %v241_v29  ;;  %v1352_v32 = vpop.f32.mrb[4].mxu0  ;;  %v529_v29 = vld [vmem:[%s1577_s4] sm:$0xff]  ;;  %v530_v30 = vld [vmem:[%s1577_s4 + $0x8] sm:$0xff] }
 0x159   :  { %v227_v33 = vsel %vm58_vm0, %v1352_v32, 0.0  ;;  %v239_v34 = vmul.f32 %v1352_v32, %v1352_v32  ;;  %v217_v35 = vpop.f32.mrb[5].mxu0 }
 0x15a   :  { %v228_v36 = vadd.f32 %v227_v33, %v226_v28  ;;  %v1041_v33 = vpack.c.bf16 %v530_v30, %v529_v29 }
 0x15b   :  { %v244_v37 = vsel %vm58_vm0, %v239_v34, 0.0  ;;  %v532_v34 = vld [vmem:[%s1577_s4 + $0x18] sm:$0xff] }
 0x15c   :  { %v245_v38 = vadd.f32 %v244_v37, %v243_v31  ;;  %v1359_v39 = vpop.f32.mrb[6].mxu0  ;;  %v531_v31 = vld [vmem:[%s1577_s4 + $0x10] sm:$0xff]  ;;  %v534_v37 = vld [vmem:[%s1577_s4 + $0x28] sm:$0xff] }
 0x15d   :  { %v229_v40 = vsel %vm58_vm0, %v1359_v39, 0.0  ;;  %v240_v41 = vmul.f32 %v1359_v39, %v1359_v39  ;;  %v222_v42 = vpop.f32.mrb[7].mxu0  ;;  %v1044_v35 = vpack.c.bf16 %v532_v34, %v531_v31 }
 0x15e   :  { %v230_v43 = vadd.f32 %v229_v40, %v228_v36  ;;  %v533_v36 = vld [vmem:[%s1577_s4 + $0x20] sm:$0xff]  ;;  %v535_v40 = vld [vmem:[%s1577_s4 + $0x30] sm:$0xff] }
 0x15f   :  { %v246_v44 = vsel %vm58_vm0, %v240_v41, 0.0  ;;  %v536_v41 = vld [vmem:[%s1577_s4 + $0x38] sm:$0xff] }
 0x160   :  { %v231_v45 = vrot.slane %v230_v43, 4  ;;  %v247_v46 = vadd.f32 %v246_v44, %v245_v38  ;;  %v1047_v38 = vpack.c.bf16 %v534_v37, %v533_v36  ;;  %v1050_v42 = vpack.c.bf16 %v536_v41, %v535_v40  ;;  %v538_v44 = vld [vmem:[%s1577_s4 + $0x48] sm:$0xff] }
 0x162   :  { %v232_v47 = vadd.f32 %v231_v45, %v230_v43  ;;  %v248_v48 = vrot.slane %v247_v46, 4  ;;  %v537_v43 = vld [vmem:[%s1577_s4 + $0x40] sm:$0xff] }
 0x163   :  { %v1053_v45 = vpack.c.bf16 %v538_v44, %v537_v43 }
 0x164   :  { %v233_v49 = vrot.slane %v232_v47, 2  ;;  %v249_v50 = vadd.f32 %v248_v48, %v247_v46  ;;  %v539_v46 = vld [vmem:[%s1577_s4 + $0x50] sm:$0xff] }
 0x166   :  { %v234_v51 = vadd.f32 %v233_v49, %v232_v47  ;;  %v250_v52 = vrot.slane %v249_v50, 2  ;;  %v540_v47 = vld [vmem:[%s1577_s4 + $0x58] sm:$0xff]  ;;  %v541_v49 = vld [vmem:[%s1577_s4 + $0x60] sm:$0xff] }
 0x167   :  { %v1056_v48 = vpack.c.bf16 %v540_v47, %v539_v46 }
 0x168   :  { %v235_v53 = vrot.slane %v234_v51, 1  ;;  %v251_v54 = vadd.f32 %v250_v52, %v249_v50  ;;  %v542_v50 = vld [vmem:[%s1577_s4 + $0x68] sm:$0xff]  ;;  %v543_v52 = vld [vmem:[%s1577_s4 + $0x70] sm:$0xff] }
 0x16a   :  { %v252_v55 = vrot.slane %v251_v54, 1  ;;  %v236_v56 = vadd.f32 %v235_v53, %v234_v51  ;;  %v1059_v51 = vpack.c.bf16 %v542_v50, %v541_v49  ;;  %v544_v53 = vld [vmem:[%s1577_s4 + $0x78] sm:$0xff] }
 0x16c   :  { %v253_v57 = vadd.f32 %v252_v55, %v251_v54  ;;  %v1062_v54 = vpack.c.bf16 %v544_v53, %v543_v52  ;;  %v545_v55 = vld [vmem:[%s1577_s4 + $0x80] sm:$0xff] }
 0x16e   :  { %v254_v58 = vsel %vm45_vm5, %v236_v56, %v253_v57  ;;  %v546_v56 = vld [vmem:[%s1577_s4 + $0x88] sm:$0xff] }
 0x16f   :  { %961 = vmatmul.mubr.msk.f32.vlgmr.msra.gmra.mrb[0].mxu1 %vm58_vm0, %v254_v58  ;;  %v1065_v57 = vpack.c.bf16 %v546_v56, %v545_v55  ;;  %v547_v58 = vld [vmem:[%s1577_s4 + $0x90] sm:$0xff] }
 0x170   :  { %965 = vmatprep.mubr.msk.f32.mxu1 %vm1100_vm7, %v1099_v10  ;;  %964 = vmatpush3.msk.msra.mxu1 %vm379_vm8, %v374_v59  ;;  %v548_v59 = vld [vmem:[%s1577_s4 + $0x98] sm:$0xff] }
 0x171   :  { %1040 = vmatprep.subr.bf16.mxu1 %v1097_v3 }
 0x242   :  { %v332_v60 = vpop.f32.mrb[0].mxu1 }
 0x243   :  { %v337_v61 = vmul.f32 0.001953125, %v332_v60  ;;  %v962_v62 = vpop.f32.mrb[1].mxu1  ;;  %v1068_v60 = vpack.c.bf16 %v548_v59, %v547_v58 }
 0x244   :  { %v550_v62 = vld [vmem:[%s1577_s4 + $0xa8] sm:$0xff] }
 0x245   :  { %v338_v63 = vmul.f32 %v337_v61, %v337_v61 }
 0x247   :  { %v340_v4 = vrot.slane %v338_v63, 7 }
 0x249   :  { %v342_v5 = vsub.f32 %v337_v61, %v340_v4  ;;  %v463_v4 = vsub.s32 1, %v1375_v13 }
 0x24b   :  { %v344_v6 = vadd.f32 1e-05, %v342_v5  ;;  %v551_v5 = vld [vmem:[%s1577_s4 + $0xb0] sm:$0xff] }
 0x24d   :  { %1093 = vrsqrt.f32 %v344_v6  ;;  %v552_v6 = vld [vmem:[%s1577_s4 + $0xb8] sm:$0xff] }
 0x24e   :  { %v1074_v9 = vpack.c.bf16 %v552_v6, %v551_v5 }
 0x257   :  { %v1094_v15 = vpop.eup %1093 }
 0x258   :  { %v353_v16 = vrot.slane %v1094_v15, %v1378_v14 }
 0x25a   :  { %v354_v17 = vcombine.high %v353_v16, %v353_v16 }
 0x25c   :  { %v361_v19 = vrot.slane %v354_v17, %v1378_v14 }
 0x25e   :  { %v363_v21 = vmul.f32 %v361_v19, %v343_v18 }
 0x260   :  { %v365_v24 = vmul.f32 %v363_v21, %v337_v61  ;;  %v549_v61 = vld [vmem:[%s1577_s4 + $0xa0] sm:$0xff] }
 0x261   :  { %v1071_v63 = vpack.c.bf16 %v550_v62, %v549_v61 }
 0x262   :  { %v366_v26 = vsub.f32 %v364_v22, %v365_v24 }
 0x264   :  { %v371_v27 = vrot.slane %v366_v26, %v1389_v25 }
 0x266   :  { %v373_v28 = vsel %vm45_vm5, %v363_v21, %v371_v27 }
 0x267   :  { %966 = vmatmul.mubr.msk.f32.vlgmr.msra.gmra.mrb[2].mxu1 %vm375_vm9, %v373_v28 }
 0x268   :  { %1042 = vmatpush1.bf16.msra.mxu1 %v1041_v33 }
 0x269   :  { %1043 = vmatprep.subr.bf16.mxu1 %v1097_v3 }
 0x26c   :  { %1045 = vmatpush1.bf16.msra.mxu1 %v1044_v35 }
 0x26d   :  { %1046 = vmatprep.subr.bf16.mxu1 %v1097_v3 }
 0x270   :  { %1048 = vmatpush1.bf16.msra.mxu1 %v1047_v38 }
 0x271   :  { %1049 = vmatprep.subr.bf16.mxu1 %v1097_v3 }
 0x274   :  { %1051 = vmatpush1.bf16.msra.mxu1 %v1050_v42 }
 0x275   :  { %1052 = vmatprep.subr.bf16.mxu1 %v1097_v3 }
 0x278   :  { %1054 = vmatpush1.bf16.msra.mxu1 %v1053_v45 }
 0x279   :  { %1055 = vmatprep.subr.bf16.mxu1 %v1097_v3 }
 0x27c   :  { %1057 = vmatpush1.bf16.msra.mxu1 %v1056_v48 }
 0x27d   :  { %1058 = vmatprep.subr.bf16.mxu1 %v1097_v3 }
 0x280   :  { %1060 = vmatpush1.bf16.msra.mxu1 %v1059_v51 }
 0x281   :  { %1061 = vmatprep.subr.bf16.mxu1 %v1097_v3 }
 0x284   :  { %1063 = vmatpush1.bf16.msra.mxu1 %v1062_v54 }
 0x285   :  { %1064 = vmatprep.subr.bf16.mxu1 %v1097_v3 }
 0x288   :  { %1066 = vmatpush1.bf16.msra.mxu1 %v1065_v57 }
 0x289   :  { %1067 = vmatprep.subr.bf16.mxu1 %v1097_v3 }
 0x28c   :  { %1069 = vmatpush1.bf16.msra.mxu1 %v1068_v60 }
 0x28d   :  { %1070 = vmatprep.subr.bf16.mxu1 %v1097_v3 }
 0x290   :  { %1072 = vmatpush1.bf16.msra.mxu1 %v1071_v63 }
 0x291   :  { %1073 = vmatprep.subr.bf16.mxu1 %v1097_v3 }
 0x294   :  { %1075 = vmatpush1.bf16.msra.mxu1 %v1074_v9 }
 0x33a   :  { %v449_v7 = vpop.f32.mrb[2].mxu1 }
 0x33b   :  { %v456_v11 = vrot.slane %v449_v7, %v1389_v25  ;;  %v967_v12 = vpop.f32.mrb[3].mxu1  ;;  %v464_v15 = vrot.slane %v449_v7, %v463_v4 }
 0x33d   :  { %v458_v16 = vmul.f32 %v456_v11, %v1342_v23  ;;  %v457_v3 = vmul.f32 %v456_v11, %v1338_v20  ;;  %v460_v17 = vmul.f32 %v456_v11, %v1359_v39  ;;  %v459_v18 = vmul.f32 %v456_v11, %v1352_v32 }
 0x33f   :  { %v466_v19 = vadd.f32 %v464_v15, %v458_v16  ;;  %v465_v21 = vadd.f32 %v464_v15, %v457_v3  ;;  %v468_v22 = vadd.f32 %v464_v15, %v460_v17  ;;  %v467_v24 = vadd.f32 %v464_v15, %v459_v18 }
 0x341   :  { %v470_v26 = vmax.f32 %v466_v19, 0.0  ;;  %v469_v27 = vmax.f32 %v465_v21, 0.0  ;;  %v472_v28 = vmax.f32 %v468_v22, 0.0  ;;  %v471_v29 = vmax.f32 %v467_v24, 0.0 }
 0x343   :  { %493 = vrot.lane.b32.xlu1 %v470_v26, %s1098_s15  ;;  %v478_v30 = vrot.slane %v470_v26, 7  ;;  %v508_v31 = vrot.slane %v470_v26, 1  ;;  %491 = vrot.lane.b32.xlu0 %v469_v27, %s1098_s15  ;;  %v477_v23 = vrot.slane %v469_v27, 7  ;;  %v507_v20 = vrot.slane %v469_v27, 1 }
 0x344   :  { %v481_v33 = vrot.slane %v472_v28, 7  ;;  %v511_v39 = vrot.slane %v472_v28, 1  ;;  %v480_v34 = vrot.slane %v471_v29, 7  ;;  %v510_v32 = vrot.slane %v471_v29, 1 }
 0x345   :  { %518 = vst.msk [vmem:[#allocation2 + $0x18] sm:$0x7f] %vm91_vm2, %v508_v31  ;;  %v509_v35 = vsel %vm79_vm1, %v507_v20, %v508_v31  ;;  %v479_v36 = vsel %vm45_vm5, %v477_v23, %v478_v30 }
 0x346   :  { %487 = vst.msk [vmem:[#allocation2] sm:$0xfe] %vm56_vm4, %v477_v23  ;;  %v512_v37 = vsel %vm79_vm1, %v510_v32, %v511_v39  ;;  %489 = vst.msk [vmem:[#allocation2 + $0x20] sm:$0xfe] %vm56_vm4, %v480_v34  ;;  %v482_v38 = vsel %vm45_vm5, %v480_v34, %v481_v33 }
 0x347   :  { %517 = vst.msk [vmem:[#allocation2 + $0x8] sm:$0xff] %vm58_vm0, %v509_v35  ;;  %488 = vst.msk [vmem:[#allocation2 + $0x10] sm:$0xff] %vm58_vm0, %v479_v36  ;;  %497 = vrot.lane.b32.xlu1 %v472_v28, %s1098_s15  ;;  %495 = vrot.lane.b32.xlu0 %v471_v29, %s1098_s15  ;;  %v799_v35 = vld [vmem:[%s1574_s8] sm:$0xf] }
 0x348   :  { %520 = vst.msk [vmem:[#allocation2 + $0x38] sm:$0x7f] %vm91_vm2, %v511_v39 }
 0x349   :  { %519 = vst.msk [vmem:[#allocation2 + $0x28] sm:$0xff] %vm58_vm0, %v512_v37  ;;  %490 = vst.msk [vmem:[#allocation2 + $0x30] sm:$0xff] %vm58_vm0, %v482_v38 }
 0x34c   :  { %v524_v46 = vld [vmem:[#allocation2 + $0x18] sm:$0xff] }
 0x34e   :  { %v522_v40 = vld [vmem:[#allocation2 + $0x8] sm:$0xff] }
 0x34f   :  { %915 = vmatprep.mubr.msk.f32.mxu1 %vm58_vm0, %v522_v40  ;;  %v528_v50 = vld [vmem:[#allocation2 + $0x38] sm:$0xff] }
 0x350   :  { %v526_v48 = vld [vmem:[#allocation2 + $0x28] sm:$0xff] }
 0x3b5   :  { %v494_v41 = vpop.permute.xlu1 %493  ;;  %v492_v42 = vpop.permute.xlu0 %491 }
 0x3b6   :  { %504 = vst.msk [vmem:[#allocation2 + $0x10] sm:$0xff] %vm74_vm6, %v494_v41  ;;  %503 = vst.msk [vmem:[#allocation2] sm:$0xff] %vm74_vm6, %v492_v42 }
 0x3b9   :  { %v498_v43 = vpop.permute.xlu1 %497  ;;  %v496_v44 = vpop.permute.xlu0 %495 }
 0x3ba   :  { %506 = vst.msk [vmem:[#allocation2 + $0x30] sm:$0xff] %vm74_vm6, %v498_v43  ;;  %505 = vst.msk [vmem:[#allocation2 + $0x20] sm:$0xff] %vm74_vm6, %v496_v44 }
 0x3bd   :  { %v521_v45 = vld [vmem:[#allocation2] sm:$0xff]  ;;  %v523_v47 = vld [vmem:[#allocation2 + $0x10] sm:$0xff] }
 0x3be   :  { %630 = vmatmul.mubr.f32.vlgmr.msra.gmra.mrb[4].mxu1 %v521_v45 }
 0x3bf   :  { %916 = vmatprep.mubr.msk.f32.mxu1 %vm58_vm0, %v524_v46 }
 0x3c1   :  { %v525_v49 = vld [vmem:[#allocation2 + $0x20] sm:$0xff]  ;;  %v527_v51 = vld [vmem:[#allocation2 + $0x30] sm:$0xff] }
 0x3c2   :  { %635 = vmatmul.mubr.f32.gmra.mrb[6].mxu1 %v523_v47 }
 0x3c3   :  { %917 = vmatprep.mubr.msk.f32.mxu1 %vm58_vm0, %v526_v48 }
 0x3c6   :  { %640 = vmatmul.mubr.f32.gmra.mrb[8].mxu1 %v525_v49  ;;  %v789_v49 = vld [vmem:[%s1579_s6] sm:$0x1] }
 0x3c7   :  { %918 = vmatprep.mubr.msk.f32.mxu1 %vm58_vm0, %v528_v50 }
 0x3ca   :  { %645 = vmatmul.mubr.f32.gmra.mrb[10].mxu1 %v527_v51 }
 0x491   :  { %v1509_v52 = vpop.f32.mrb[4].mxu1 }
 0x492   :  { %v633_v53 = vpop.f32.mrb[5].mxu1  ;;  %v663_v54 = vmul.f32 %v1509_v52, %v1509_v52  ;;  %v650_v56 = vsel %vm58_vm0, %v1509_v52, 0.0 }
 0x494   :  { %v667_v61 = vsel %vm58_vm0, %v663_v54, 0.0 }
 0x495   :  { %v1513_v55 = vpop.f32.mrb[6].mxu1 }
 0x496   :  { %v651_v57 = vsel %vm58_vm0, %v1513_v55, 0.0  ;;  %v664_v58 = vmul.f32 %v1513_v55, %v1513_v55  ;;  %v638_v59 = vpop.f32.mrb[7].mxu1 }
 0x497   :  { %v652_v60 = vadd.f32 %v651_v57, %v650_v56 }
 0x498   :  { %v668_v62 = vsel %vm58_vm0, %v664_v58, 0.0 }
 0x499   :  { %v669_v63 = vadd.f32 %v668_v62, %v667_v61  ;;  %v641_v5 = vpop.f32.mrb[8].mxu1 }
 0x49a   :  { %v653_v6 = vsel %vm58_vm0, %v641_v5, 0.0  ;;  %v665_v7 = vmul.f32 %v641_v5, %v641_v5  ;;  %v643_v9 = vpop.f32.mrb[9].mxu1 }
 0x49b   :  { %v654_v11 = vadd.f32 %v653_v6, %v652_v60 }
 0x49c   :  { %v670_v12 = vsel %vm58_vm0, %v665_v7, 0.0 }
 0x49d   :  { %v671_v15 = vadd.f32 %v670_v12, %v669_v63  ;;  %v646_v16 = vpop.f32.mrb[10].mxu1 }
 0x49e   :  { %v655_v3 = vsel %vm58_vm0, %v646_v16, 0.0  ;;  %v666_v17 = vmul.f32 %v646_v16, %v646_v16  ;;  %v648_v18 = vpop.f32.mrb[11].mxu1 }
 0x49f   :  { %v656_v19 = vadd.f32 %v655_v3, %v654_v11 }
 0x4a0   :  { %v672_v21 = vsel %vm58_vm0, %v666_v17, 0.0 }
 0x4a1   :  { %v657_v22 = vrot.slane %v656_v19, 4  ;;  %v673_v24 = vadd.f32 %v672_v21, %v671_v15 }
 0x4a3   :  { %v658_v26 = vadd.f32 %v657_v22, %v656_v19  ;;  %v674_v27 = vrot.slane %v673_v24, 4 }
 0x4a5   :  { %v659_v28 = vrot.slane %v658_v26, 2  ;;  %v675_v29 = vadd.f32 %v674_v27, %v673_v24 }
 0x4a7   :  { %v660_v30 = vadd.f32 %v659_v28, %v658_v26  ;;  %v676_v31 = vrot.slane %v675_v29, 2 }
 0x4a9   :  { %v661_v23 = vrot.slane %v660_v30, 1  ;;  %v677_v20 = vadd.f32 %v676_v31, %v675_v29 }
 0x4ab   :  { %v678_v33 = vrot.slane %v677_v20, 1  ;;  %v662_v39 = vadd.f32 %v661_v23, %v660_v30 }
 0x4ad   :  { %v679_v34 = vadd.f32 %v678_v33, %v677_v20 }
 0x4af   :  { %v680_v32 = vsel %vm45_vm5, %v662_v39, %v679_v34 }
 0x4b0   :  { %985 = vmatmul.mubr.msk.f32.vlgmr.msra.gmra.mrb[8].mxu0 %vm58_vm0, %v680_v32 }
 0x4b1   :  { %989 = vmatprep.mubr.msk.f32.mxu0 %vm1100_vm7, %v1099_v10  ;;  %988 = vmatpush3.msk.msra.mxu0 %vm379_vm8, %v799_v35  ;;  %v768_v10 = vld [vmem:[%s1578_s5] sm:$0x1] }
 0x583   :  { %v758_v36 = vpop.f32.mrb[8].mxu0 }
 0x584   :  { %v762_v37 = vmul.f32 0.001953125, %v758_v36  ;;  %v986_v38 = vpop.f32.mrb[9].mxu0 }
 0x586   :  { %v763_v40 = vmul.f32 %v762_v37, %v762_v37 }
 0x588   :  { %v765_v41 = vrot.slane %v763_v40, 7 }
 0x58a   :  { %v767_v42 = vsub.f32 %v762_v37, %v765_v41 }
 0x58c   :  { %v769_v43 = vadd.f32 1e-05, %v767_v42 }
 0x58e   :  { %1095 = vrsqrt.f32 %v769_v43 }
 0x598   :  { %v1096_v44 = vpop.eup %1095 }
 0x599   :  { %v778_v45 = vrot.slane %v1096_v44, %v1378_v14 }
 0x59b   :  { %v779_v46 = vcombine.high %v778_v45, %v778_v45 }
 0x59d   :  { %v786_v47 = vrot.slane %v779_v46, %v1378_v14 }
 0x59f   :  { %v788_v48 = vmul.f32 %v786_v47, %v768_v10 }
 0x5a1   :  { %v790_v50 = vmul.f32 %v788_v48, %v762_v37 }
 0x5a3   :  { %v791_v51 = vsub.f32 %v789_v49, %v790_v50 }
 0x5a5   :  { %v796_v53 = vrot.slane %v791_v51, %v1389_v25 }
 0x5a7   :  { %v798_v54 = vsel %vm45_vm5, %v788_v48, %v796_v53 }
 0x5a8   :  { %990 = vmatmul.mubr.msk.f32.vlgmr.msra.gmra.mrb[10].mxu0 %vm375_vm9, %v798_v54 }
 0x67b   :  { %v872_v56 = vpop.f32.mrb[10].mxu0 }
 0x67c   :  { %v879_v57 = vrot.slane %v872_v56, %v1389_v25  ;;  %v991_v58 = vpop.f32.mrb[11].mxu0  ;;  %v887_v14 = vrot.slane %v872_v56, %v463_v4 }
 0x67e   :  { %v880_v59 = vmul.f32 %v879_v57, %v1509_v52  ;;  %v881_v60 = vmul.f32 %v879_v57, %v1513_v55  ;;  %v882_v61 = vmul.f32 %v879_v57, %v641_v5  ;;  %v883_v62 = vmul.f32 %v879_v57, %v646_v16 }
 0x680   :  { %v888_v63 = vadd.f32 %v887_v14, %v880_v59  ;;  %v889_v6 = vadd.f32 %v887_v14, %v881_v60  ;;  %v890_v7 = vadd.f32 %v887_v14, %v882_v61  ;;  %v891_v9 = vadd.f32 %v887_v14, %v883_v62 }
 0x682   :  { %v892_v11 = vadd.f32 %v888_v63, %v1155_v0  ;;  %v893_v12 = vadd.f32 %v889_v6, %v1160_v1  ;;  %v894_v25 = vadd.f32 %v890_v7, %v1165_v2  ;;  %v895_v15 = vadd.f32 %v891_v9, %v1180_v8 }
 0x684   :  { %v896_v13 = vmax.f32 %v892_v11, 0.0  ;;  %v897_v4 = vmax.f32 %v893_v12, 0.0  ;;  %v898_v3 = vmax.f32 %v894_v25, 0.0  ;;  %v899_v52 = vmax.f32 %v895_v15, 0.0 }
 0x686   :  { %900 = vst.msk [vmem:[%s1580_s9] sm:$0xff] %vm58_vm0, %v896_v13  ;;  %901 = vst.msk [vmem:[%s1580_s9 + $0x8] sm:$0xff] %vm58_vm0, %v897_v4 }
 0x687   :  { %902 = vst.msk [vmem:[%s1580_s9 + $0x10] sm:$0xff] %vm58_vm0, %v898_v3  ;;  %903 = vst.msk [vmem:[%s1580_s9 + $0x18] sm:$0xff] %vm58_vm0, %v899_v52 }

</bundles_post_ra>
